<compile_context>
chip_gen: v5e
topology: v5e:2x2
jax: 0.10.0
libtpu: 0.0.40
codegen_flags: <defaults>
</compile_context>

<pallas_src>
import functools

import jax
import jax.numpy as jnp
from jax.experimental import pallas as pl
from jax.experimental.pallas import tpu as pltpu

_PAD = 8  # interior rows start at a sublane-aligned offset; rows _PAD-1 and _PAD+H are the halo


def _resblock_kernel(x_ref, wb1_ref, bb1_ref, wb2_ref, bb2_ref, w3b_ref, bb3_ref,
                     o_ref, pad_ref, *, H, WC):
    """One image per grid program.

    x_ref / o_ref : (H, W*C)      lane-dense activation slab
    wb*_ref       : (3, W*C, W*C) banded weights, one matrix per ky tap
    bb*_ref       : (1, W*C)      per-channel bias tiled across x
    w3b_ref       : (W*C, W*C)    block-diagonal 1x1-conv weight
    pad_ref       : (_PAD+H+1, W*C) reused y-padded scratch (interior at rows _PAD.._PAD+H-1)
    """
    x = x_ref[...]                                                    # (H, WC) f32

    # Zero only the two halo rows (they stay zero for both convs); no full-buffer memset.
    zero_row = jnp.zeros((1, WC), jnp.float32)
    pad_ref[_PAD - 1:_PAD, :] = zero_row
    pad_ref[_PAD + H:_PAD + H + 1, :] = zero_row

    def conv3x3(src, wb_ref, bb_ref):
        pad_ref[_PAD:_PAD + H, :] = src                               # aligned interior store
        t0 = jnp.dot(pad_ref[_PAD - 1:_PAD - 1 + H, :], wb_ref[0],
                     preferred_element_type=jnp.float32)              # ky = 0 tap (row y-1)
        t1 = jnp.dot(src, wb_ref[1],
                     preferred_element_type=jnp.float32)              # ky = 1 tap (row y)
        t2 = jnp.dot(pad_ref[_PAD + 1:_PAD + 1 + H, :], wb_ref[2],
                     preferred_element_type=jnp.float32)              # ky = 2 tap (row y+1)
        return t0 + t1 + t2 + bb_ref[...]

    h1 = jnp.maximum(conv3x3(x, wb1_ref, bb1_ref), 0.0)
    h2 = jnp.maximum(conv3x3(h1, wb2_ref, bb2_ref), 0.0)
    h3 = jnp.dot(h2, w3b_ref[...], preferred_element_type=jnp.float32) + bb3_ref[...]
    o_ref[...] = h3 + x                                               # residual, lane-dense store


def prepare_resblock_params(params, W):
    """Pack PyTorch-layout conv weights into banded lane-dense matrices (done once at init)."""
    w1, b1, w2, b2, w3, b3 = params
    C = w1.shape[0]
    WC = W * C
    f32 = jnp.float32

    def hwio(w):  # (O, I, kH, kW) -> (kH, kW, I, O)
        return jnp.transpose(w, (2, 3, 1, 0)).astype(f32)

    # eye(W, k=-(kx-1))[x_in, x_out] selects x_in = x_out + kx - 1; x zero-padding is implicit
    # because out-of-range x_in simply has no row in the band matrix.
    eyes = [jnp.eye(W, W, k=-(kx - 1), dtype=f32) for kx in range(3)]

    def band3(w):  # (O, I, 3, 3) -> (3, W*C, W*C), one band matrix per ky tap
        wk = hwio(w)
        mats = []
        for ky in range(3):
            m = sum(jnp.einsum('xy,io->xiyo', eyes[kx], wk[ky, kx]) for kx in range(3))
            mats.append(m.reshape(WC, WC))
        return jnp.stack(mats)

    w3k = jnp.transpose(w3[:, :, 0, 0], (1, 0)).astype(f32)           # (I, O)
    w3b = jnp.einsum('xy,io->xiyo', jnp.eye(W, dtype=f32), w3k).reshape(WC, WC)

    def tile_bias(b):
        return jnp.tile(b.astype(f32), W).reshape(1, WC)              # [x*C + co] -> b[co]

    return band3(w1), tile_bias(b1), band3(w2), tile_bias(b2), w3b, tile_bias(b3)


def resblock_pallas_nhwc(x_nhwc, prepared):
    """x_nhwc: (N, H, W, C); prepared: output of prepare_resblock_params."""
    N, H, W, C = x_nhwc.shape
    WC = W * C
    wb1, bb1, wb2, bb2, w3b, bb3 = prepared
    x = x_nhwc.reshape(N, H, WC).astype(jnp.float32)                  # free reshape, lane-dense

    kern = functools.partial(_resblock_kernel, H=H, WC=WC)
    out = pl.pallas_call(
        kern,
        out_shape=jax.ShapeDtypeStruct((N, H, WC), jnp.float32),
        grid=(N,),
        in_specs=[
            pl.BlockSpec((None, H, WC), lambda n: (n, 0, 0)),         # one image per program
            pl.BlockSpec((3, WC, WC), lambda n: (0, 0, 0)),           # wb1 (resident)
            pl.BlockSpec((1, WC), lambda n: (0, 0)),                  # bb1
            pl.BlockSpec((3, WC, WC), lambda n: (0, 0, 0)),           # wb2
            pl.BlockSpec((1, WC), lambda n: (0, 0)),                  # bb2
            pl.BlockSpec((WC, WC), lambda n: (0, 0)),                 # w3b
            pl.BlockSpec((1, WC), lambda n: (0, 0)),                  # bb3
        ],
        out_specs=pl.BlockSpec((None, H, WC), lambda n: (n, 0, 0)),
        scratch_shapes=[pltpu.VMEM((_PAD + H + 1, WC), jnp.float32)],  # single reused pad buffer
        compiler_params=pltpu.CompilerParams(
            dimension_semantics=("parallel",),
            vmem_limit_bytes=32 * 1024 * 1024),
    )(x, wb1, bb1, wb2, bb2, w3b, bb3)
    return out.reshape(N, H, W, C)


def resblock_pallas(x_nchw, params):
    """NCHW adapter matching the PyTorch module. In a full DiscreteVAE, keep activations in
    NHWC between layers and call prepare_resblock_params once at init instead of per call."""
    prepared = prepare_resblock_params(params, x_nchw.shape[3])
    x_nhwc = jnp.transpose(x_nchw, (0, 2, 3, 1)).astype(jnp.float32)
    out = resblock_pallas_nhwc(x_nhwc, prepared)
    return jnp.transpose(out, (0, 3, 1, 2))


def resblock_ref(x, params):
    """Pure-JAX reference (matches the PyTorch module)."""
    w1, b1, w2, b2, w3, b3 = params
    dn = ('NCHW', 'OIHW', 'NCHW')
    h = jax.lax.conv_general_dilated(x, w1, (1, 1), 'SAME',
                                     dimension_numbers=dn) + b1[None, :, None, None]
    h = jnp.maximum(h, 0.0)
    h = jax.lax.conv_general_dilated(h, w2, (1, 1), 'SAME',
                                     dimension_numbers=dn) + b2[None, :, None, None]
    h = jnp.maximum(h, 0.0)
    h = jax.lax.conv_general_dilated(h, w3, (1, 1), 'SAME',
                                     dimension_numbers=dn) + b3[None, :, None, None]
    return h + x


def init_params(key, chan):
    """Deterministic init mimicking PyTorch's Conv2d default (uniform +/- 1/sqrt(fan_in))."""
    ks = jax.random.split(key, 6)

    def u(k, shape, fan_in):
        bound = 1.0 / (fan_in ** 0.5)
        return jax.random.uniform(k, shape, jnp.float32, -bound, bound)

    w1 = u(ks[0], (chan, chan, 3, 3), chan * 9)
    b1 = u(ks[1], (chan,), chan * 9)
    w2 = u(ks[2], (chan, chan, 3, 3), chan * 9)
    b2 = u(ks[3], (chan,), chan * 9)
    w3 = u(ks[4], (chan, chan, 1, 1), chan)
    b3 = u(ks[5], (chan,), chan)
    return w1, b1, w2, b2, w3, b3


if __name__ == "__main__":
    key = jax.random.PRNGKey(0)
    k_x, k_p = jax.random.split(key)

    N, C, H, W = 2, 4, 16, 16
    x = jax.random.normal(k_x, (N, C, H, W), jnp.float32)
    params = init_params(k_p, C)

    out = resblock_pallas(x, params)
    out = jax.block_until_ready(out)

    ref = resblock_ref(x, params)
    assert out.shape == (N, C, H, W)
    assert jnp.allclose(out, ref, atol=1e-4, rtol=1e-4), (
        f"max abs err {jnp.max(jnp.abs(out - ref))}")

    print("KERNEL_OK")
</pallas_src>

<mosaic_0001>
module attributes {stable_mosaic.version = 11 : i64} {
  func.func @_resblock_kernel(%arg0: i32, %arg1: memref<1x16x64xf32, #tpu.memory_space<vmem>>, %arg2: memref<3x64x64xf32, #tpu.memory_space<vmem>>, %arg3: memref<1x64xf32, #tpu.memory_space<vmem>>, %arg4: memref<3x64x64xf32, #tpu.memory_space<vmem>>, %arg5: memref<1x64xf32, #tpu.memory_space<vmem>>, %arg6: memref<64x64xf32, #tpu.memory_space<vmem>>, %arg7: memref<1x64xf32, #tpu.memory_space<vmem>>, %arg8: memref<1x16x64xf32, #tpu.memory_space<vmem>>, %arg9: memref<25x64xf32, #tpu.memory_space<vmem>>) attributes {dimension_semantics = [#tpu.dimension_semantics<parallel>], iteration_bounds = array<i64: 2>, scalar_prefetch = 0 : i64, scratch_operands = 1 : i64, tpu.core_type = #tpu.core_type<tc>, window_params = [{transform_indices = @transform_0, window_bounds = array<i64: 1, 16, 64>}, {pipeline_mode = #tpu.pipeline_mode<synchronous>, transform_indices = @transform_1, window_bounds = array<i64: 3, 64, 64>}, {pipeline_mode = #tpu.pipeline_mode<synchronous>, transform_indices = @transform_2, window_bounds = array<i64: 1, 64>}, {pipeline_mode = #tpu.pipeline_mode<synchronous>, transform_indices = @transform_3, window_bounds = array<i64: 3, 64, 64>}, {pipeline_mode = #tpu.pipeline_mode<synchronous>, transform_indices = @transform_4, window_bounds = array<i64: 1, 64>}, {pipeline_mode = #tpu.pipeline_mode<synchronous>, transform_indices = @transform_5, window_bounds = array<i64: 64, 64>}, {pipeline_mode = #tpu.pipeline_mode<synchronous>, transform_indices = @transform_6, window_bounds = array<i64: 1, 64>}, {transform_indices = @transform_7, window_bounds = array<i64: 1, 16, 64>}]} {
    %c0 = arith.constant 0 : index
    %c0_0 = arith.constant 0 : index
    %c0_1 = arith.constant 0 : index
    %0 = vector.load %arg1[%c0, %c0_0, %c0_1] : memref<1x16x64xf32, #tpu.memory_space<vmem>>, vector<1x16x64xf32>
    %1 = vector.shape_cast %0 : vector<1x16x64xf32> to vector<16x64xf32>
    %cst = arith.constant 0.000000e+00 : f32
    %2 = vector.broadcast %cst : f32 to vector<1x64xf32>
    %c7 = arith.constant 7 : index
    %c0_2 = arith.constant 0 : index
    %3 = vector.load %arg9[%c7, %c0_2] : memref<25x64xf32, #tpu.memory_space<vmem>>, vector<1x64xf32>
    tpu.vector_store %arg9[%c7, %c0_2], %2 {strides = array<i32>} : memref<25x64xf32, #tpu.memory_space<vmem>>, vector<1x64xf32>,
    %c24 = arith.constant 24 : index
    %c0_3 = arith.constant 0 : index
    %4 = vector.load %arg9[%c24, %c0_3] : memref<25x64xf32, #tpu.memory_space<vmem>>, vector<1x64xf32>
    tpu.vector_store %arg9[%c24, %c0_3], %2 {strides = array<i32>} : memref<25x64xf32, #tpu.memory_space<vmem>>, vector<1x64xf32>,
    %c8 = arith.constant 8 : index
    %c0_4 = arith.constant 0 : index
    %5 = vector.load %arg9[%c8, %c0_4] : memref<25x64xf32, #tpu.memory_space<vmem>>, vector<16x64xf32>
    tpu.vector_store %arg9[%c8, %c0_4], %1 {strides = array<i32>} : memref<25x64xf32, #tpu.memory_space<vmem>>, vector<16x64xf32>,
    %c7_5 = arith.constant 7 : index
    %c0_6 = arith.constant 0 : index
    %6 = vector.load %arg9[%c7_5, %c0_6] : memref<25x64xf32, #tpu.memory_space<vmem>>, vector<16x64xf32>
    %c0_7 = arith.constant 0 : index
    %c0_8 = arith.constant 0 : index
    %c0_9 = arith.constant 0 : index
    %7 = vector.load %arg2[%c0_7, %c0_8, %c0_9] : memref<3x64x64xf32, #tpu.memory_space<vmem>>, vector<1x64x64xf32>
    %8 = vector.shape_cast %7 : vector<1x64x64xf32> to vector<64x64xf32>
    %cst_10 = arith.constant dense<0.000000e+00> : vector<16x64xf32>
    %9 = tpu.matmul %6, %8, %cst_10 {dimension_numbers = #tpu.dot_dimension_numbers<[1], [0], [0], [1], [0, 0, 1, 1], [], []>} : vector<16x64xf32>, vector<64x64xf32>, vector<16x64xf32> -> vector<16x64xf32>
    %c1 = arith.constant 1 : index
    %c0_11 = arith.constant 0 : index
    %c0_12 = arith.constant 0 : index
    %10 = vector.load %arg2[%c1, %c0_11, %c0_12] : memref<3x64x64xf32, #tpu.memory_space<vmem>>, vector<1x64x64xf32>
    %11 = vector.shape_cast %10 : vector<1x64x64xf32> to vector<64x64xf32>
    %cst_13 = arith.constant dense<0.000000e+00> : vector<16x64xf32>
    %12 = tpu.matmul %1, %11, %cst_13 {dimension_numbers = #tpu.dot_dimension_numbers<[1], [0], [0], [1], [0, 0, 1, 1], [], []>} : vector<16x64xf32>, vector<64x64xf32>, vector<16x64xf32> -> vector<16x64xf32>
    %c9 = arith.constant 9 : index
    %c0_14 = arith.constant 0 : index
    %13 = vector.load %arg9[%c9, %c0_14] : memref<25x64xf32, #tpu.memory_space<vmem>>, vector<16x64xf32>
    %c2 = arith.constant 2 : index
    %c0_15 = arith.constant 0 : index
    %c0_16 = arith.constant 0 : index
    %14 = vector.load %arg2[%c2, %c0_15, %c0_16] : memref<3x64x64xf32, #tpu.memory_space<vmem>>, vector<1x64x64xf32>
    %15 = vector.shape_cast %14 : vector<1x64x64xf32> to vector<64x64xf32>
    %cst_17 = arith.constant dense<0.000000e+00> : vector<16x64xf32>
    %16 = tpu.matmul %13, %15, %cst_17 {dimension_numbers = #tpu.dot_dimension_numbers<[1], [0], [0], [1], [0, 0, 1, 1], [], []>} : vector<16x64xf32>, vector<64x64xf32>, vector<16x64xf32> -> vector<16x64xf32>
    %17 = arith.addf %9, %12 : vector<16x64xf32>
    %18 = arith.addf %17, %16 : vector<16x64xf32>
    %c0_18 = arith.constant 0 : index
    %c0_19 = arith.constant 0 : index
    %19 = vector.load %arg3[%c0_18, %c0_19] : memref<1x64xf32, #tpu.memory_space<vmem>>, vector<1x64xf32>
    %20 = vector.broadcast %19 : vector<1x64xf32> to vector<16x64xf32>
    %21 = arith.addf %18, %20 : vector<16x64xf32>
    %cst_20 = arith.constant 0.000000e+00 : f32
    %22 = vector.broadcast %cst_20 : f32 to vector<16x64xf32>
    %23 = arith.maximumf %21, %22 : vector<16x64xf32>
    %c8_21 = arith.constant 8 : index
    %c0_22 = arith.constant 0 : index
    %24 = vector.load %arg9[%c8_21, %c0_22] : memref<25x64xf32, #tpu.memory_space<vmem>>, vector<16x64xf32>
    tpu.vector_store %arg9[%c8_21, %c0_22], %23 {strides = array<i32>} : memref<25x64xf32, #tpu.memory_space<vmem>>, vector<16x64xf32>,
    %c7_23 = arith.constant 7 : index
    %c0_24 = arith.constant 0 : index
    %25 = vector.load %arg9[%c7_23, %c0_24] : memref<25x64xf32, #tpu.memory_space<vmem>>, vector<16x64xf32>
    %c0_25 = arith.constant 0 : index
    %c0_26 = arith.constant 0 : index
    %c0_27 = arith.constant 0 : index
    %26 = vector.load %arg4[%c0_25, %c0_26, %c0_27] : memref<3x64x64xf32, #tpu.memory_space<vmem>>, vector<1x64x64xf32>
    %27 = vector.shape_cast %26 : vector<1x64x64xf32> to vector<64x64xf32>
    %cst_28 = arith.constant dense<0.000000e+00> : vector<16x64xf32>
    %28 = tpu.matmul %25, %27, %cst_28 {dimension_numbers = #tpu.dot_dimension_numbers<[1], [0], [0], [1], [0, 0, 1, 1], [], []>} : vector<16x64xf32>, vector<64x64xf32>, vector<16x64xf32> -> vector<16x64xf32>
    %c1_29 = arith.constant 1 : index
    %c0_30 = arith.constant 0 : index
    %c0_31 = arith.constant 0 : index
    %29 = vector.load %arg4[%c1_29, %c0_30, %c0_31] : memref<3x64x64xf32, #tpu.memory_space<vmem>>, vector<1x64x64xf32>
    %30 = vector.shape_cast %29 : vector<1x64x64xf32> to vector<64x64xf32>
    %cst_32 = arith.constant dense<0.000000e+00> : vector<16x64xf32>
    %31 = tpu.matmul %23, %30, %cst_32 {dimension_numbers = #tpu.dot_dimension_numbers<[1], [0], [0], [1], [0, 0, 1, 1], [], []>} : vector<16x64xf32>, vector<64x64xf32>, vector<16x64xf32> -> vector<16x64xf32>
    %c9_33 = arith.constant 9 : index
    %c0_34 = arith.constant 0 : index
    %32 = vector.load %arg9[%c9_33, %c0_34] : memref<25x64xf32, #tpu.memory_space<vmem>>, vector<16x64xf32>
    %c2_35 = arith.constant 2 : index
    %c0_36 = arith.constant 0 : index
    %c0_37 = arith.constant 0 : index
    %33 = vector.load %arg4[%c2_35, %c0_36, %c0_37] : memref<3x64x64xf32, #tpu.memory_space<vmem>>, vector<1x64x64xf32>
    %34 = vector.shape_cast %33 : vector<1x64x64xf32> to vector<64x64xf32>
    %cst_38 = arith.constant dense<0.000000e+00> : vector<16x64xf32>
    %35 = tpu.matmul %32, %34, %cst_38 {dimension_numbers = #tpu.dot_dimension_numbers<[1], [0], [0], [1], [0, 0, 1, 1], [], []>} : vector<16x64xf32>, vector<64x64xf32>, vector<16x64xf32> -> vector<16x64xf32>
    %36 = arith.addf %28, %31 : vector<16x64xf32>
    %37 = arith.addf %36, %35 : vector<16x64xf32>
    %c0_39 = arith.constant 0 : index
    %c0_40 = arith.constant 0 : index
    %38 = vector.load %arg5[%c0_39, %c0_40] : memref<1x64xf32, #tpu.memory_space<vmem>>, vector<1x64xf32>
    %39 = vector.broadcast %38 : vector<1x64xf32> to vector<16x64xf32>
    %40 = arith.addf %37, %39 : vector<16x64xf32>
    %cst_41 = arith.constant 0.000000e+00 : f32
    %41 = vector.broadcast %cst_41 : f32 to vector<16x64xf32>
    %42 = arith.maximumf %40, %41 : vector<16x64xf32>
    %c0_42 = arith.constant 0 : index
    %c0_43 = arith.constant 0 : index
    %43 = vector.load %arg6[%c0_42, %c0_43] : memref<64x64xf32, #tpu.memory_space<vmem>>, vector<64x64xf32>
    %cst_44 = arith.constant dense<0.000000e+00> : vector<16x64xf32>
    %44 = tpu.matmul %42, %43, %cst_44 {dimension_numbers = #tpu.dot_dimension_numbers<[1], [0], [0], [1], [0, 0, 1, 1], [], []>} : vector<16x64xf32>, vector<64x64xf32>, vector<16x64xf32> -> vector<16x64xf32>
    %c0_45 = arith.constant 0 : index
    %c0_46 = arith.constant 0 : index
    %45 = vector.load %arg7[%c0_45, %c0_46] : memref<1x64xf32, #tpu.memory_space<vmem>>, vector<1x64xf32>
    %46 = vector.broadcast %45 : vector<1x64xf32> to vector<16x64xf32>
    %47 = arith.addf %44, %46 : vector<16x64xf32>
    %48 = arith.addf %47, %1 : vector<16x64xf32>
    %c0_47 = arith.constant 0 : index
    %c0_48 = arith.constant 0 : index
    %c0_49 = arith.constant 0 : index
    %49 = vector.load %arg8[%c0_47, %c0_48, %c0_49] : memref<1x16x64xf32, #tpu.memory_space<vmem>>, vector<1x16x64xf32>
    %50 = vector.shape_cast %49 : vector<1x16x64xf32> to vector<16x64xf32>
    %51 = vector.shape_cast %48 : vector<16x64xf32> to vector<1x16x64xf32>
    tpu.vector_store %arg8[%c0_47, %c0_48, %c0_49], %51 {strides = array<i32>} : memref<1x16x64xf32, #tpu.memory_space<vmem>>, vector<1x16x64xf32>,
    return
  }
  func.func @transform_0(%arg0: i32) -> (i32, i32, i32) {
    %c0_i32 = arith.constant 0 : i32
    %c0_i32_0 = arith.constant 0 : i32
    %c0_i32_1 = arith.constant 0 : i32
    return %arg0, %c0_i32, %c0_i32_0 : i32, i32, i32
  }
  func.func @transform_1(%arg0: i32) -> (i32, i32, i32) {
    %c0_i32 = arith.constant 0 : i32
    %c0_i32_0 = arith.constant 0 : i32
    %c0_i32_1 = arith.constant 0 : i32
    %c0_i32_2 = arith.constant 0 : i32
    return %c0_i32, %c0_i32_0, %c0_i32_1 : i32, i32, i32
  }
  func.func @transform_2(%arg0: i32) -> (i32, i32) {
    %c0_i32 = arith.constant 0 : i32
    %c0_i32_0 = arith.constant 0 : i32
    %c0_i32_1 = arith.constant 0 : i32
    return %c0_i32, %c0_i32_0 : i32, i32
  }
  func.func @transform_3(%arg0: i32) -> (i32, i32, i32) {
    %c0_i32 = arith.constant 0 : i32
    %c0_i32_0 = arith.constant 0 : i32
    %c0_i32_1 = arith.constant 0 : i32
    %c0_i32_2 = arith.constant 0 : i32
    return %c0_i32, %c0_i32_0, %c0_i32_1 : i32, i32, i32
  }
  func.func @transform_4(%arg0: i32) -> (i32, i32) {
    %c0_i32 = arith.constant 0 : i32
    %c0_i32_0 = arith.constant 0 : i32
    %c0_i32_1 = arith.constant 0 : i32
    return %c0_i32, %c0_i32_0 : i32, i32
  }
  func.func @transform_5(%arg0: i32) -> (i32, i32) {
    %c0_i32 = arith.constant 0 : i32
    %c0_i32_0 = arith.constant 0 : i32
    %c0_i32_1 = arith.constant 0 : i32
    return %c0_i32, %c0_i32_0 : i32, i32
  }
  func.func @transform_6(%arg0: i32) -> (i32, i32) {
    %c0_i32 = arith.constant 0 : i32
    %c0_i32_0 = arith.constant 0 : i32
    %c0_i32_1 = arith.constant 0 : i32
    return %c0_i32, %c0_i32_0 : i32, i32
  }
  func.func @transform_7(%arg0: i32) -> (i32, i32, i32) {
    %c0_i32 = arith.constant 0 : i32
    %c0_i32_0 = arith.constant 0 : i32
    %c0_i32_1 = arith.constant 0 : i32
    return %arg0, %c0_i32, %c0_i32_0 : i32, i32, i32
  }
}

</mosaic_0001>

<bundles_post_ra>
// kernel: tpu_custom_call.1
= control target key start
LH: loop header
LB: loop body
LE: loop exit
PB: predicated region body
PF: predicated region fallthrough
CT: control target
= control target key end

     0   :  { %s1366_s0 = inlined_call_operand.hbm [shape: f32[2,16,64], index: 0, kind: input, shape index: {}]   ;;  %s1367_s1 = inlined_call_operand.hbm [shape: f32[3,64,64], index: 1, kind: input, shape index: {}]   ;;  %s1368_s2 = inlined_call_operand.vmem [shape: f32[1,64], index: 2, kind: input, shape index: {}]   ;;  %s1369_s3 = inlined_call_operand.hbm [shape: f32[3,64,64], index: 3, kind: input, shape index: {}]   ;;  %s1370_s4 = inlined_call_operand.vmem [shape: f32[1,64], index: 4, kind: input, shape index: {}]   ;;  %s1371_s5 = inlined_call_operand.hbm [shape: f32[64,64], index: 5, kind: input, shape index: {}]   ;;  %s1372_s6 = inlined_call_operand.vmem [shape: f32[1,64], index: 6, kind: input, shape index: {}]   ;;  %s1373_s7 = inlined_call_operand.hbm [shape: f32[2,16,64], index: 7, kind: output, shape index: {}]  }
   0x1   :  { %1376 = sst [smem:[#allocation16_spill]] %s1367_s1 }
   0x2   :  { %12 = vsyncpa [#allocation4], 0 }
   0x3   :  { %14 = vsyncpa [#allocation4 + $0x1], 0 }
   0x4   :  { %15 = vsyncpa [#allocation7], 0 }
   0x5   :  { %16 = vsyncpa [#allocation10], 0 }
   0x6   :  { %17 = vsyncpa [#allocation5], 0 }
   0x7   :  { %19 = vsyncpa [#allocation5 + $0x1], 0  ;;  %s1149_s24 = smov 0   ;;  %s1151_s25 = smov 0  }
   0x8   :  { %s1153_s26 = smov 0   ;;  %s1155_s27 = smov 0  }
   0x9 LB: > { %s1170_s28 = sadd.s32 4294967295, %s1099_s27   ;;  %s776_s29 = sadd.s32 4294967294, %s1099_s27   ;;  %s1099_s27 = sphi %s1155_s27, %s1390_s27   ;;  %s1095_s26 = sphi %s1153_s26, %s1389_s26   ;;  %s1091_s25 = sphi %s1151_s25, %s1388_s25   ;;  %s1087_s24 = sphi %s1149_s24, %s1387_s24  }
   0xa   : > { %p45_p0 = scmp.ne.s32.totalorder %s1091_s25, %s1087_s24  ;;  %p46_p1 = scmp.eq.s32.totalorder %s1170_s28, 0 }
   0xb   : > { %p195_p2 = scmp.eq.s32.totalorder %s1170_s28, 1  ;;  %p201_p3 = scmp.eq.s32.totalorder %s776_s29, 1 }
   0xc   : > { %p1179_p4 = por %p46_p1, %p45_p0  ;;  %p777_p5 = scmp.ge.s32.totalorder %s1099_s27, 1 }
   0xd   : > { %p1184_p6 = por %p201_p3, %p45_p0  ;;  %p208_p7 = scmp.lt.s32.totalorder %s1099_s27, 3 }
   0xe   : > { %s1379_s1 = sld [smem:[#allocation16_spill]]  ;;  %s1101_s13 = smov [#allocation6]  }
   0xf   : > { %p1192_p8 = pnand %p777_p5, %p208_p7  ;;  %s221_s14 = sshll.u32 %s1101_s13, 4  ;;  %s222_s14 = int_to_ptr.vmem [resolvable:$true] %s221_s14 }
  0x10   : > { %s236_s18 = sshll.u32 %s1369_s3, 4  ;;  %s1374_s19 = smov 128   ;;  %s237_s18 = int_to_ptr.hbm [resolvable:$true] %s236_s18 }
  0x11   : > { %p836_p9 = pneg %p1192_p8  ;;  %s1375_s20 = smov 8  }
  0x12   : > { %s1104_s21 = smov [#allocation8]   ;;  %s253_s9 = sshll.u32 %s1371_s5, 4  ;;  %s254_s9 = int_to_ptr.hbm [resolvable:$true] %s253_s9 }
  0x13   : > { %p1200_p10 = pnand %p836_p9, %p46_p1  ;;  %s238_s22 = sshll.u32 %s1104_s21, 4  ;;  %s239_s22 = int_to_ptr.vmem [resolvable:$true] %s238_s22 }
  0x14   : > { %s219_s11 = sshll.u32 %s1379_s1, 4  ;;  %s1105_s10 = smov [#allocation9]   ;;  %s220_s11 = int_to_ptr.hbm [resolvable:$true] %s219_s11 }
  0x15   : > { %839 = dma.hbm_to_vmem [thread:$0]  (!%p1200_p10), %s220_s11, 3072, %s222_s14, [#allocation7], %s1374_s19, %s1374_s19, %s1375_s20  }
  0x16   : > { %842 = dma.hbm_to_vmem [thread:$0]  (!%p1200_p10), %s237_s18, 3072, %s239_s22, [#allocation7], %s1374_s19, %s1374_s19, %s1375_s20  }
  0x17   : > { %s255_s11 = sshll.u32 %s1105_s10, 4  ;;  %s1222_s13 = sadd.s32 1, %s1099_s27   ;;  %s256_s11 = int_to_ptr.vmem [resolvable:$true] %s255_s11 }
  0x18   : > { %845 = dma.hbm_to_vmem [thread:$0]  (!%p1200_p10), %s254_s9, 1024, %s256_s11, [#allocation10], %s1374_s19, %s1374_s19, %s1375_s20  }
  0x19   : > { %s29_s14 = ssub.s32 %s1099_s27, %s1222_s13  ;;  %s32_s16 = sadd.s32 1, %s1095_s26 }
  0x1a   : > { %p30_p12 = scmp.eq.s32.totalorder %s29_s14, 0  ;;  %p39_p13 = scmp.ne.s32.totalorder %s1095_s26, %s1091_s25 }
  0x1b   : > { %p40_p0 = scmp.eq.s32.totalorder %s1099_s27, 0  ;;  %p857_p5 = scmp.lt.s32.totalorder %s1099_s27, 2 }
  0x1c   : > { %s1236_s17 = scalar_select %p30_p12, %s1095_s26, %s32_s16  }
  0x1d   : > { %p1240_p3 = por %p195_p2, %p39_p13  ;;  %s272_s21 = sand.u32 1, %s1095_s26  }
  0x1e   : > { %s810_s15 = sshll.u32 %s1099_s27, 4  ;;  %p41_p7 = por %p40_p0, %p39_p13 }
  0x1f   : > { %s782_s22 = sshll.u32 %s272_s21, 4  ;;  %s281_s9 = scalar_lea.hbm %s1366_s0, %s810_s15 }
  0x20   : > { %s282_s10 = sshll.u32 %s281_s9, 4  ;;  %s276_s11 = scalar_lea.vmem [#allocation3], %s782_s22  ;;  %s283_s10 = int_to_ptr.hbm [resolvable:$true] %s282_s10 }
  0x21   : > { %s284_s14 = sshll.u32 %s276_s11, 4  ;;  %p1250_p9 = pnand %p857_p5, %p41_p7  ;;  %s285_s14 = int_to_ptr.vmem [resolvable:$true] %s284_s14 }
  0x22   : > { %s273_s19 = scalar_lea.sflag [#allocation4], %s272_s21  ;;  %s995_s20 = sshra.s32 %s283_s10, 4  ;;  %s996_s20 = int_to_ptr.hbm [resolvable:$true] %s995_s20 }
  0x23   : > { %s997_s1 = scalar_lea.hbm %s996_s20, 16  ;;  %p999_p10 = pneg %p1250_p9 }
  0x24   : > { %p998_p2 = scmp.ne.s32.totalorder %s996_s20, %s997_s1  ;;  %s1002_s22 = scalar_lea.hbm %s1366_s0, 32 }
  0x25   : > { %p1003_p0 = scmp.lt.s32.totalorder %s996_s20, %s1366_s0  ;;  %p1004_p5 = scmp.lt.s32.totalorder %s1002_s22, %s997_s1 }
  0x26   : > { %p1000_p12 = pnand %p999_p10, %p998_p2 }
  0x27   : > { %p1005_p7 = por %p1004_p5, %p1003_p0 }
  0x28   : > { %p1001_p13 = pneg %p1000_p12 }
  0x2a   : > { %p1006_p11 = pnand %p1005_p7, %p1001_p13 }
  0x2c   : > { %1009 = shalt.err (!%p1006_p11)
}
  0x2d   : > { %s1384_s21 = smov 8   ;;  %s1385_s11 = smov 128  }
  0x2e   : > { %849 = dma.hbm_to_vmem [thread:$0]  (!%p1250_p9), %s283_s10, 256, %s285_s14, %s273_s19, %s1385_s11, %s1385_s11, %s1384_s21  }
  0x2f   : > { %296 = sbr.rel (%p1192_p8) target bundleno = 509 (0x1fd), region = 48  ;;  %s1270_s15 = sand.u32 (!%p1192_p8), 1, %s1091_s25  }
  0x30   : > { %s786_s1 = sshll.u32 (!%p1192_p8), %s1270_s15, 4  ;;  %s299_s20 = scalar_lea.sflag (!%p1192_p8), [#allocation4], %s1270_s15 }
  0x31   : > { %s1276_s23 = scalar_lea.vmem (!%p1192_p8), [#allocation3], %s786_s1 }
  0x34   : > { %1070 = dma.done.wait (%p1179_p4), %s299_s20, 256  }
  0x35   : > { %1072 = vsyncadd (%p1179_p4), %s299_s20, 4294967040 }
  0x36   : > { %1074 = dma.done.wait (%p46_p1), [#allocation7], 6144  }
  0x37   : > { %1076 = vsyncadd (%p46_p1), [#allocation7], 4294961152 }
  0x38   : > { %1078 = dma.done.wait (%p46_p1), [#allocation10], 1024  }
  0x39   : > { %1080 = vsyncadd (%p46_p1), [#allocation10], 4294966272  ;;  %vm351_vm0 = vcmask 516096   ;;  %v1106_v0 = vmov 0.0   ;;  %v366_v1 = vld [vmem:[#allocation6 + $0x38] sm:$0xff]  ;;  %v365_v2 = vld [vmem:[#allocation6 + $0x30] sm:$0xff] }
  0x3a   : > { %352 = vst.msk [vmem:[#allocation2 + $0x7] sm:$0x1] %vm351_vm0, %v1106_v0  ;;  %459 = vmatpush.msra.mxu2 %v366_v1  ;;  %v375_v3 = vld [vmem:[#allocation6 + $0x78] sm:$0xff]  ;;  %v374_v4 = vld [vmem:[#allocation6 + $0x70] sm:$0xff]  ;;  %v364_v5 = vld [vmem:[#allocation6 + $0x28] sm:$0xff]  ;;  %vm354_vm1 = vcmask 523264  }
  0x3b   : > { %353 = vst.msk [vmem:[#allocation2 + $0x18] sm:$0x1] %vm351_vm0, %v1106_v0  ;;  %390 = vmatpush.msra.mxu0 %v375_v3  ;;  %v415_v6 = vld [vmem:[#allocation6 + $0xb8] sm:$0xff]  ;;  %v373_v7 = vld [vmem:[#allocation6 + $0x68] sm:$0xff]  ;;  %v414_v8 = vld [vmem:[#allocation6 + $0xb0] sm:$0xff]  ;;  %s811_s22 = sshll.u32 %s1170_s28, 4 }
  0x3c   : > { %460 = vmatpush.msra.mxu2 %v365_v2  ;;  %430 = vmatpush.msra.mxu1 %v415_v6  ;;  %v363_v9 = vld [vmem:[#allocation6 + $0x20] sm:$0xff]  ;;  %v413_v10 = vld [vmem:[#allocation6 + $0xa8] sm:$0xff]  ;;  %v362_v13 = vld [vmem:[#allocation6 + $0x18] sm:$0xff]  ;;  %s670_s21 = scalar_lea.hbm %s1373_s7, %s811_s22  ;;  %s348_s11 = scalar_lea.vmem [#allocation11], %s786_s1 }
  0x3d   : > { %391 = vmatpush.msra.mxu0 %v374_v4  ;;  %v372_v11 = vld [vmem:[#allocation6 + $0x60] sm:$0xff]  ;;  %v361_v15 = vld [vmem:[#allocation6 + $0x10] sm:$0xff]  ;;  %v371_v16 = vld [vmem:[#allocation6 + $0x58] sm:$0xff]  ;;  %s671_s20 = sshll.u32 %s348_s11, 4  ;;  %s659_s28 = scalar_lea.sflag [#allocation5], %s1270_s15  ;;  %s672_s20 = int_to_ptr.vmem [resolvable:$true] %s671_s20 }
  0x3e   : > { %461 = vmatpush.msra.mxu2 %v364_v5  ;;  %431 = vmatpush.msra.mxu1 %v414_v8  ;;  %v1291_v12 = vld [vmem:[%s1276_s23] sm:$0xff]  ;;  %v360_v17 = vld [vmem:[#allocation6 + $0x8] sm:$0xff]  ;;  %v411_v18 = vld [vmem:[#allocation6 + $0x98] sm:$0xff]  ;;  %s1045_s10 = scalar_lea.hbm %s1373_s7, 32 }
  0x3f   : > { %392 = vmatpush.msra.mxu0 %v373_v7  ;;  %v412_v14 = vld [vmem:[#allocation6 + $0xa0] sm:$0xff]  ;;  %355 = vst.msk [vmem:[#allocation2 + $0x8] sm:$0xff] %vm354_vm1, %v1291_v12  ;;  %v1296_v19 = vld [vmem:[%s1276_s23 + $0x8] sm:$0xff]  ;;  %v370_v21 = vld [vmem:[#allocation6 + $0x50] sm:$0xff]  ;;  %s673_s23 = sshll.u32 %s670_s21, 4  ;;  %s674_s23 = int_to_ptr.hbm [resolvable:$true] %s673_s23 }
  0x40   : > { %462 = vmatpush.msra.mxu2 %v363_v9  ;;  %432 = vmatpush.msra.mxu1 %v413_v10  ;;  %v504_v20 = vld [vmem:[#allocation8 + $0x78] sm:$0xff]  ;;  %356 = vst.msk [vmem:[#allocation2 + $0x10] sm:$0xff] %vm354_vm1, %v1296_v19  ;;  %v503_v22 = vld [vmem:[#allocation8 + $0x70] sm:$0xff]  ;;  %v369_v24 = vld [vmem:[#allocation6 + $0x48] sm:$0xff]  ;;  %s1039_s30 = sshra.s32 %s674_s23, 4  ;;  %s1040_s30 = int_to_ptr.hbm [resolvable:$true] %s1039_s30 }
  0x41   : > { %393 = vmatpush.msra.mxu0 %v372_v11  ;;  %v410_v23 = vld [vmem:[#allocation6 + $0x90] sm:$0xff]  ;;  %519 = vmatpush.msra.mxu3 %v504_v20  ;;  %v502_v25 = vld [vmem:[#allocation8 + $0x68] sm:$0xff]  ;;  %v359_v26 = vld [vmem:[#allocation6] sm:$0xff]  ;;  %s1041_s12 = scalar_lea.hbm %s1040_s30, 16  ;;  %p1046_p11 = scmp.lt.s32.totalorder %s1040_s30, %s1373_s7 }
  0x42   : > { %463 = vmatpush.msra.mxu2 %v362_v13  ;;  %433 = vmatpush.msra.mxu1 %v412_v14  ;;  %v409_v27 = vld [vmem:[#allocation6 + $0x88] sm:$0xff]  ;;  %v368_v29 = vld [vmem:[#allocation6 + $0x40] sm:$0xff]  ;;  %v500_v35 = vld [vmem:[#allocation8 + $0x58] sm:$0xff]  ;;  %p1042_p1 = scmp.ne.s32.totalorder %s1040_s30, %s1041_s12  ;;  %p1047_p9 = scmp.lt.s32.totalorder %s1045_s10, %s1041_s12 }
  0x43   : > { %394 = vmatpush.msra.mxu0 %v371_v16  ;;  %520 = vmatpush.msra.mxu3 %v503_v22  ;;  %v408_v30 = vld [vmem:[#allocation6 + $0x80] sm:$0xff]  ;;  %v495_v36 = vld [vmem:[#allocation8 + $0x38] sm:$0xff]  ;;  %v499_v37 = vld [vmem:[#allocation8 + $0x50] sm:$0xff] }
  0x44   : > { %464 = vmatpush.msra.mxu2 %v361_v15  ;;  %434 = vmatpush.msra.mxu1 %v411_v18  ;;  %v501_v34 = vld [vmem:[#allocation8 + $0x60] sm:$0xff]  ;;  %v494_v38 = vld [vmem:[#allocation8 + $0x30] sm:$0xff]  ;;  %v498_v39 = vld [vmem:[#allocation8 + $0x48] sm:$0xff]  ;;  %p1043_p4 = pnand %p1042_p1, %p1240_p3  ;;  %p1048_p2 = por %p1047_p9, %p1046_p11 }
  0x45   : > { %395 = vmatpush.msra.mxu0 %v370_v21  ;;  %521 = vmatpush.msra.mxu3 %v502_v25  ;;  %v493_v40 = vld [vmem:[#allocation8 + $0x28] sm:$0xff]  ;;  %v497_v41 = vld [vmem:[#allocation8 + $0x40] sm:$0xff]  ;;  %v544_v43 = vld [vmem:[#allocation8 + $0xb8] sm:$0xff] }
  0x46   : > { %465 = vmatpush.msra.mxu2 %v360_v17  ;;  %v357_v28 = vld [vmem:[#allocation2 + $0x7] sm:$0xff]  ;;  %435 = vmatpush.msra.mxu1 %v410_v23  ;;  %v491_v44 = vld [vmem:[#allocation8 + $0x18] sm:$0xff]  ;;  %v543_v45 = vld [vmem:[#allocation8 + $0xb0] sm:$0xff]  ;;  %p1044_p8 = pneg %p1043_p4 }
  0x47   : > { %396 = vmatpush.msra.mxu0 %v369_v24  ;;  %v405_v31 = vld [vmem:[#allocation2 + $0x9] sm:$0xff]  ;;  %v406_v33 = vld [vmem:[#allocation2 + $0x11] sm:$0xff]  ;;  %522 = vmatpush.msra.mxu3 %v501_v34  ;;  %v492_v42 = vld [vmem:[#allocation8 + $0x20] sm:$0xff] }
  0x48   : > { %466 = vmatpush.msra.mxu2 %v359_v26  ;;  %436 = vmatpush.msra.mxu1 %v409_v27  ;;  %v358_v32 = vld [vmem:[#allocation2 + $0xf] sm:$0xff]  ;;  %v541_v49 = vld [vmem:[#allocation8 + $0xa0] sm:$0xff]  ;;  %v540_v51 = vld [vmem:[#allocation8 + $0x98] sm:$0xff]  ;;  %p1049_p10 = pnand %p1048_p2, %p1044_p8 }
  0x49   : > { %795 = vmatmul.msk.f32.vlgmr.msra.gmra.mxu2 %vm354_vm1, %v357_v28  ;;  %397 = vmatpush.msra.mxu0 %v368_v29  ;;  %v490_v46 = vld [vmem:[#allocation8 + $0x10] sm:$0xff]  ;;  %v542_v47 = vld [vmem:[#allocation8 + $0xa8] sm:$0xff]  ;;  %v488_v50 = vld [vmem:[#allocation8] sm:$0xff] }
  0x4a   : > { %791 = vmatmul.msk.f32.vlgmr.msra.gmra.mxu0 %vm354_vm1, %v1291_v12  ;;  %437 = vmatpush.msra.mxu1 %v408_v30  ;;  %v489_v48 = vld [vmem:[#allocation8 + $0x8] sm:$0xff]  ;;  %v539_v52 = vld [vmem:[#allocation8 + $0x90] sm:$0xff]  ;;  %v537_v54 = vld [vmem:[#allocation8 + $0x80] sm:$0xff] }
  0x4b   : > { %793 = vmatmul.msk.f32.vlgmr.msra.gmra.mxu1 %vm354_vm1, %v405_v31  ;;  %523 = vmatpush.msra.mxu3 %v500_v35  ;;  %v538_v53 = vld [vmem:[#allocation8 + $0x88] sm:$0xff]  ;;  %v902_v59 = vld [vmem:[%s1368_s2] ss:$0 sm:$0xff]  ;;  %v620_v10 = vld [vmem:[#allocation9 + $0x38] sm:$0xff] }
  0x4c   : > { %588 = vmatpush.msrb.mxu1 %v495_v36  ;;  %559 = vmatpush.msrb.mxu0 %v544_v43  ;;  %v619_v11 = vld [vmem:[#allocation9 + $0x30] sm:$0xff]  ;;  %v618_v13 = vld [vmem:[#allocation9 + $0x28] sm:$0xff]  ;;  %v617_v14 = vld [vmem:[#allocation9 + $0x20] sm:$0xff] }
  0x4d   : > { %524 = vmatpush.msra.mxu3 %v499_v37  ;;  %639 = vmatpush.msrb.mxu2 %v620_v10  ;;  %v616_v15 = vld [vmem:[#allocation9 + $0x18] sm:$0xff]  ;;  %v615_v16 = vld [vmem:[#allocation9 + $0x10] sm:$0xff]  ;;  %v614_v17 = vld [vmem:[#allocation9 + $0x8] sm:$0xff] }
  0x4e   : > { %589 = vmatpush.msrb.mxu1 %v494_v38  ;;  %560 = vmatpush.msrb.mxu0 %v543_v45  ;;  %v613_v18 = vld [vmem:[#allocation9] sm:$0xff] }
  0x4f   : > { %525 = vmatpush.msra.mxu3 %v498_v39  ;;  %640 = vmatpush.msrb.mxu2 %v619_v11  ;;  %v903_v24 = vld [vmem:[%s1370_s4] ss:$0 sm:$0xff] }
  0x50   : > { %590 = vmatpush.msrb.mxu1 %v493_v40  ;;  %561 = vmatpush.msrb.mxu0 %v542_v47  ;;  %v904_v35 = vld [vmem:[%s1372_s6] ss:$0 sm:$0xff] }
  0x51   : > { %796 = vmatmul.msk.f32.gmra.mxu2 %vm354_vm1, %v358_v32  ;;  %526 = vmatpush.msra.mxu3 %v497_v41 }
  0x52   : > { %792 = vmatmul.msk.f32.gmra.mxu0 %vm354_vm1, %v1296_v19  ;;  %591 = vmatpush.msrb.mxu1 %v492_v42 }
  0x53   : > { %794 = vmatmul.msk.f32.gmra.mxu1 %vm354_vm1, %v406_v33  ;;  %812 = vmatpush.msrb.mxu3 %v544_v43 }
  0x54   : > { %592 = vmatpush.msrb.mxu1 %v491_v44  ;;  %562 = vmatpush.msrb.mxu0 %v541_v49 }
  0x55   : > { %813 = vmatpush.msrb.mxu3 %v543_v45  ;;  %641 = vmatpush.msrb.mxu2 %v618_v13 }
  0x56   : > { %593 = vmatpush.msrb.mxu1 %v490_v46  ;;  %563 = vmatpush.msrb.mxu0 %v540_v51 }
  0x57   : > { %814 = vmatpush.msrb.mxu3 %v542_v47  ;;  %642 = vmatpush.msrb.mxu2 %v617_v14 }
  0x58   : > { %594 = vmatpush.msrb.mxu1 %v489_v48  ;;  %564 = vmatpush.msrb.mxu0 %v539_v52 }
  0x59   : > { %815 = vmatpush.msrb.mxu3 %v541_v49  ;;  %643 = vmatpush.msrb.mxu2 %v616_v15 }
  0x5a   : > { %595 = vmatpush.msrb.mxu1 %v488_v50  ;;  %565 = vmatpush.msrb.mxu0 %v538_v53 }
  0x5b   : > { %816 = vmatpush.msrb.mxu3 %v540_v51  ;;  %644 = vmatpush.msrb.mxu2 %v615_v16 }
  0x5c   : > { %566 = vmatpush.msrb.mxu0 %v537_v54 }
  0x5d   : > { %817 = vmatpush.msrb.mxu3 %v539_v52  ;;  %645 = vmatpush.msrb.mxu2 %v614_v17 }
  0x5f   : > { %818 = vmatpush.msrb.mxu3 %v538_v53  ;;  %646 = vmatpush.msrb.mxu2 %v613_v18 }
  0x61   : > { %819 = vmatpush.msrb.mxu3 %v537_v54 }
  0xc7   : > { %v399_v55 = vpop.f32.mrf.mxu0 }
  0xc8   : > { %v439_v56 = vpop.f32.mrf.mxu1 }
  0xcc   : > { %v468_v57 = vpop.f32.mrf.mxu2 }
  0xcd   : > { %v469_v58 = vadd.f32 %v468_v57, %v399_v55 }
  0xcf   : > { %v474_v60 = vadd.f32 %v469_v58, %v439_v56  ;;  %v402_v62 = vpop.f32.mrf.mxu0 }
  0xd0   : > { %v442_v1 = vpop.f32.mrf.mxu1 }
  0xd1   : > { %v480_v61 = vadd.f32 %v902_v59, %v474_v60 }
  0xd3   : > { %v482_v63 = vmax.f32 %v480_v61, 0.0 }
  0xd4   : > { %v471_v0 = vpop.f32.mrf.mxu2 }
  0xd5   : > { %484 = vst.msk [vmem:[#allocation2 + $0x8] sm:$0xff] %vm354_vm1, %v482_v63  ;;  %v472_v2 = vadd.f32 %v471_v0, %v402_v62  ;;  %797 = vmatmul.msk.f32.vlgmr.msra.gmra.mxu3 %vm354_vm1, %v482_v63 }
  0xd7   : > { %v475_v3 = vadd.f32 %v472_v2, %v442_v1 }
  0xd9   : > { %v481_v4 = vadd.f32 %v902_v59, %v475_v3 }
  0xdb   : > { %v483_v5 = vmax.f32 %v481_v4, 0.0 }
  0xdc   : > { %v486_v6 = vld [vmem:[#allocation2 + $0x7] sm:$0xff] }
  0xdd   : > { %485 = vst.msk [vmem:[#allocation2 + $0x10] sm:$0xff] %vm354_vm1, %v483_v5  ;;  %798 = vmatmul.msk.f32.gmra.mxu3 %vm354_vm1, %v483_v5  ;;  %801 = vmatmul.msk.f32.vlgmr.msrb.gmra.mxu1 %vm354_vm1, %v486_v6 }
  0xe4   : > { %v534_v7 = vld [vmem:[#allocation2 + $0x9] sm:$0xff]  ;;  %v535_v8 = vld [vmem:[#allocation2 + $0x11] sm:$0xff] }
  0xe5   : > { %v487_v9 = vld [vmem:[#allocation2 + $0xf] sm:$0xff]  ;;  %799 = vmatmul.msk.f32.vlgmr.msrb.gmra.mxu0 %vm354_vm1, %v534_v7  ;;  %800 = vmatmul.msk.f32.vlgmr.msrb.gmra.mxu3 %vm354_vm1, %v535_v8 }
  0xe6   : > { %802 = vmatmul.msk.f32.gmra.mxu1 %vm354_vm1, %v487_v9 }
 0x158   : > { %v528_v20 = vpop.f32.mrf.mxu3 }
 0x15a   : > { %v597_v21 = vpop.f32.mrf.mxu1 }
 0x15b   : > { %v598_v23 = vadd.f32 %v597_v21, %v528_v20 }
 0x160   : > { %v531_v22 = vpop.f32.mrf.mxu3 }
 0x162   : > { %v568_v25 = vpop.f32.mrf.mxu0 }
 0x163   : > { %v603_v26 = vadd.f32 %v598_v23, %v568_v25  ;;  %v600_v27 = vpop.f32.mrf.mxu1 }
 0x164   : > { %v601_v30 = vadd.f32 %v600_v27, %v531_v22 }
 0x165   : > { %v609_v28 = vadd.f32 %v903_v24, %v603_v26 }
 0x167   : > { %v611_v29 = vmax.f32 %v609_v28, 0.0 }
 0x168   : > { %v571_v31 = vpop.f32.mrf.mxu3 }
 0x169   : > { %v604_v32 = vadd.f32 %v601_v30, %v571_v31  ;;  %803 = vmatmul.msk.f32.vlgmr.msrb.gmra.mxu2 %vm354_vm1, %v611_v29 }
 0x16b   : > { %v610_v33 = vadd.f32 %v903_v24, %v604_v32 }
 0x16d   : > { %v612_v34 = vmax.f32 %v610_v33, 0.0 }
 0x171   : > { %804 = vmatmul.msk.f32.gmra.mxu2 %vm354_vm1, %v612_v34 }
 0x1ec   : > { %v648_v36 = vpop.f32.mrf.mxu2 }
 0x1ed   : > { %v649_v37 = vadd.f32 %v904_v35, %v648_v36 }
 0x1ef   : > { %v654_v38 = vadd.f32 %v649_v37, %v1291_v12 }
 0x1f1   : > { %656 = vst.msk [vmem:[%s348_s11] sm:$0xff] %vm354_vm1, %v654_v38 }
 0x1f4   : > { %v651_v39 = vpop.f32.mrf.mxu2 }
 0x1f5   : > { %v652_v40 = vadd.f32 %v904_v35, %v651_v39 }
 0x1f7   : > { %v655_v41 = vadd.f32 %v652_v40, %v1296_v19 }
 0x1f9   : > { %657 = vst.msk [vmem:[%s348_s11 + $0x8] sm:$0xff] %vm354_vm1, %v655_v41 }
 0x1fa   : > { %1052 = shalt.err (!%p1049_p10)
}
 0x1fb   : > { %s1107_s15 = smov 128   ;;  %s1108_s22 = smov 8  }
 0x1fc   : > { %834 = dma.vmem_to_hbm [thread:$0]  (%p1240_p3), %s672_s20, 256, %s674_s23, %s659_s28, %s1107_s15, %s1107_s15, %s1108_s22  }
 0x1fd PF: > { %s688_s29 = sand.u32 1, %s1087_s24   ;;  %p1386_p12 = scmp.ge.s32.totalorder %s1099_s27, 2 }
 0x1fe   : > { %s689_s9 = scalar_lea.sflag [#allocation5], %s688_s29 }
 0x1ff   : > { %p851_p13 = pnand %p1386_p12, %p1184_p6 }
 0x201   : > { %p852_p0 = pneg %p851_p13 }
 0x203   : > { %1082 = dma.done.wait (%p852_p0), %s689_s9, 256  }
 0x204   : > { %1084 = vsyncadd (%p852_p0), %s689_s9, 4294967040  ;;  %p22_p5 = scmp.ge.s32.totalorder %s1222_s13, 4   ;;  %s1387_s24 = smov %s1091_s25 }
 0x205   : > { %s1388_s25 = smov %s1095_s26  ;;  %s1389_s26 = smov %s1236_s17 }
 0x206   : > { %s1390_s27 = smov %s1222_s13  ;;  %24 = sbr.rel (!%p22_p5) target bundleno = 9 (0x9), region = 109 }
 0x20b   :  { %695 = vsyncpa [#allocation4], 1 }
 0x20c   :  { %697 = vsyncpa [#allocation4 + $0x1], 1 }
 0x20d   :  { %698 = vsyncpa [#allocation7], 1 }
 0x20e   :  { %699 = vsyncpa [#allocation10], 1 }
 0x20f   :  { %700 = vsyncpa [#allocation5], 1 }
 0x210   :  { %702 = vsyncpa [#allocation5 + $0x1], 1 }

</bundles_post_ra>
